<compile_context>
chip_gen: v7x
topology: tpu7x:2x2x1
jax: 0.10.0
libtpu: 0.0.40
codegen_flags: <defaults>
</compile_context>

<pallas_src>
import jax
import jax.numpy as jnp
from jax.experimental import pallas as pl
from jax.experimental.pallas import tpu as pltpu  # noqa: F401  (TPU-specific tuning hooks)


def mra_gcn_kernel(x_ref, a_ref, th_ref, gb_ref, lw_ref, lb_ref, w_ref, bw_ref,
                   ebd_ref, out_ref):
    """Single-shot kernel: whole batch folded into lanes.

    x_ref   : (N, B*Din)             input features, columns ordered (b, d)
    a_ref   : (N, N)                 normalized adjacency
    th_ref  : (K, K, B*Din, B*Dout)  block-diag GCN weights per (range, hop)
    gb_ref  : (K, 1, B*Dout)         GCN bias, tiled over batch
    lw_ref  : (B*Dout, B*Din)        block-diag nn.Linear(dim_out, dim_in) weight
    lb_ref  : (1, B*Din)             its bias, tiled over batch
    w_ref   : (B*Din, B*Dout)        block-diag MGCN.W
    bw_ref  : (1, B*Dout)            MGCN.b, tiled over batch
    ebd_ref : (B*Dout, B*Dout)       block-diag broadcast matrix for (W_a @ U)
    out_ref : (N, B*Dout)
    """
    x = x_ref[...]
    a = a_ref[...]
    th = th_ref[...]
    gb = gb_ref[...]
    lw = lw_ref[...]
    lb = lb_ref[...]
    w = w_ref[...]
    bw = bw_ref[...]
    ebd = ebd_ref[...]
    K = th.shape[0]

    # ---- MGCN: chained k-range GCN -> linear -> sigmoid gate (whole batch) ----
    x1s = []
    for k in range(K):                       # static unroll, K is small
        ax = x                               # hop 0: A^0 x
        h = jnp.dot(ax, th[k, 0], preferred_element_type=jnp.float32)
        for i in range(1, k + 1):            # hops 1..k, A^i x built iteratively
            ax = jnp.dot(a, ax, preferred_element_type=jnp.float32)
            h = h + jnp.dot(ax, th[k, i], preferred_element_type=jnp.float32)
        h = jnp.maximum(h + gb[k], 0.0)      # ReLU, residual=False, dropout=0
        x = jnp.dot(h, lw, preferred_element_type=jnp.float32) + lb
        x1s.append(jax.nn.sigmoid(
            jnp.dot(x, w, preferred_element_type=jnp.float32) + bw))

    # ---- attention over K ranges: e_k = X1_k @ (W_a @ U), broadcast to lanes ----
    # ebd is block-diag rank-1 per batch, so column j of (X1 @ ebd) carries the
    # per-(node, batch) scalar e_k replicated across the Dout lanes of that batch.
    es = [jnp.dot(x1, ebd, preferred_element_type=jnp.float32) for x1 in x1s]
    m = es[0]
    for k in range(1, K):
        m = jnp.maximum(m, es[k])
    exps = [jnp.exp(e - m) for e in es]      # EUP
    denom = exps[0]
    for k in range(1, K):
        denom = denom + exps[k]
    inv = pl.reciprocal(denom, approx=True)  # EUP slot, effectively free

    # h = sum_k x1_k * softmax_k = (sum_k x1_k * exp_k) * inv  (inv factored out)
    num = x1s[0] * exps[0]
    for k in range(1, K):
        num = num + x1s[k] * exps[k]
    out_ref[...] = num * inv


def _block_diag(mat, B):
    """(..., p, q) -> (..., B*p, B*q): B copies of `mat` on the block diagonal."""
    eye = jnp.eye(B, dtype=mat.dtype)
    out = jnp.einsum('ab,...pq->...apbq', eye, mat)
    return out.reshape(mat.shape[:-2] + (B * mat.shape[-2], B * mat.shape[-1]))


@jax.jit
def mra_gcn_forward(X, params):
    B, N, Din = X.shape
    theta = params["theta"]
    K = theta.shape[0]
    Dout = theta.shape[-1]

    # Fold batch into the lane (feature) dimension: columns ordered (b, d).
    x2d = jnp.transpose(X, (1, 0, 2)).reshape(N, B * Din)

    # Block-diagonal / tiled weight preprocessing (plain XLA, outside the kernel).
    th_bd = _block_diag(theta, B)                                   # (K,K,B*Din,B*Dout)
    gcnb_t = jnp.tile(params["gcn_b"][:, None, :], (1, 1, B))       # (K,1,B*Dout)
    lin_bd = _block_diag(params["lin_W"], B)                        # (B*Dout,B*Din)
    linb_t = jnp.tile(params["lin_b"][None, :], (1, B))             # (1,B*Din)
    w_bd = _block_diag(params["W"], B)                              # (B*Din,B*Dout)
    bw_t = jnp.tile(params["b"][None, :], (1, B))                   # (1,B*Dout)
    wa_u = params["W_a"] @ params["U"]                              # (Dout,)  fold W_a @ U
    e_block = wa_u[:, None] * jnp.ones((1, Dout), jnp.float32)      # broadcast over lanes
    e_bd = _block_diag(e_block, B)                                  # (B*Dout,B*Dout)

    out2d = pl.pallas_call(
        mra_gcn_kernel,
        out_shape=jax.ShapeDtypeStruct((N, B * Dout), jnp.float32),
        # no grid: single invocation, all (tiny) operands fully resident in VMEM,
        # no pipeline double-buffering of the invariant weights.
    )(x2d, params["A"], th_bd, gcnb_t, lin_bd, linb_t, w_bd, bw_t, e_bd)

    return out2d.reshape(N, B, Dout).transpose(1, 0, 2)             # (B,N,Dout)


def reference_forward(X, params):
    """Plain-JAX reference of the same semantics (for correctness check)."""
    A, theta, gcn_b = params["A"], params["theta"], params["gcn_b"]
    lin_W, lin_b = params["lin_W"], params["lin_b"]
    W, b, W_a, U = params["W"], params["b"], params["W_a"], params["U"]
    K = theta.shape[0]

    x = X
    xs = []
    for k in range(K):
        ax = x
        h = jnp.einsum("bnd,de->bne", ax, theta[k, 0])
        for i in range(1, k + 1):
            ax = jnp.einsum("nm,bmd->bnd", A, ax)
            h = h + jnp.einsum("bnd,de->bne", ax, theta[k, i])
        h = jax.nn.relu(h + gcn_b[k][None, None, :])
        x = jnp.einsum("bne,ed->bnd", h, lin_W) + lin_b[None, None, :]
        xs.append(jax.nn.sigmoid(jnp.einsum("bnd,de->bne", x, W) + b[None, None, :]))
    inp = jnp.stack(xs)                                            # (K,B,N,Dout)
    e = jnp.einsum("kbnm,m->kbn", jnp.einsum("kbnd,dm->kbnm", inp, W_a), U)
    e = jnp.transpose(e, (1, 2, 0))                                # (B,N,K)
    alpha = jax.nn.softmax(e, axis=-1)
    return jnp.einsum("kbnd,bnk->bnd", inp, alpha)


def make_params(key, N, Din, Dout, K):
    keys = jax.random.split(key, 9)
    # random symmetric adjacency with self loops, symmetrically normalized
    a = (jax.random.uniform(keys[0], (N, N)) > 0.7).astype(jnp.float32)
    a = jnp.maximum(a, a.T) + jnp.eye(N, dtype=jnp.float32)
    a = jnp.minimum(a, 1.0)
    deg = jnp.sum(a, axis=-1)
    dinv = 1.0 / jnp.sqrt(deg)
    a_norm = a * dinv[:, None] * dinv[None, :]

    # per-range GCN weights; only hops i <= k are used (extra hops zeroed)
    theta = 0.1 * jax.random.normal(keys[1], (K, K, Din, Dout), jnp.float32)
    hop_mask = (jnp.arange(K)[None, :] <= jnp.arange(K)[:, None]).astype(jnp.float32)
    theta = theta * hop_mask[:, :, None, None]
    gcn_b = 0.1 * jax.random.normal(keys[2], (K, Dout), jnp.float32)

    lin_W = 0.1 * jax.random.normal(keys[3], (Dout, Din), jnp.float32)  # Linear(Dout->Din), x @ lin_W
    lin_b = 0.1 * jax.random.normal(keys[4], (Din,), jnp.float32)
    W = 0.1 * jax.random.normal(keys[5], (Din, Dout), jnp.float32)      # MGCN.W
    b = 0.1 * jax.random.normal(keys[6], (Dout,), jnp.float32)          # MGCN.b
    W_a = 0.1 * jax.random.normal(keys[7], (Dout, Dout), jnp.float32)   # MRA_GCN.W_a
    U = 0.1 * jax.random.normal(keys[8], (Dout,), jnp.float32)          # MRA_GCN.U
    return dict(A=a_norm, theta=theta, gcn_b=gcn_b, lin_W=lin_W,
                lin_b=lin_b, W=W, b=b, W_a=W_a, U=U)


if __name__ == "__main__":
    B, N, Din, Dout, K = 2, 16, 8, 32, 3
    key = jax.random.PRNGKey(0)
    kx, kp = jax.random.split(key)
    X = jax.random.normal(kx, (B, N, Din), jnp.float32)
    params = make_params(kp, N, Din, Dout, K)

    h = mra_gcn_forward(X, params)
    h = jax.block_until_ready(h)

    h_ref = reference_forward(X, params)
    assert h.shape == (B, N, Dout)
    assert bool(jnp.all(jnp.isfinite(h)))
    assert bool(jnp.allclose(h, h_ref, rtol=1e-2, atol=1e-2)), "mismatch vs JAX reference"
    print("KERNEL_OK")
</pallas_src>

<mosaic_0001>
module attributes {stable_mosaic.version = 11 : i64} {
  func.func @mra_gcn_kernel(%arg0: memref<16x16xf32, #tpu.memory_space<vmem>>, %arg1: memref<16x16xf32, #tpu.memory_space<vmem>>, %arg2: memref<3x3x16x64xf32, #tpu.memory_space<vmem>>, %arg3: memref<3x1x64xf32, #tpu.memory_space<vmem>>, %arg4: memref<64x16xf32, #tpu.memory_space<vmem>>, %arg5: memref<1x16xf32, #tpu.memory_space<vmem>>, %arg6: memref<16x64xf32, #tpu.memory_space<vmem>>, %arg7: memref<1x64xf32, #tpu.memory_space<vmem>>, %arg8: memref<64x64xf32, #tpu.memory_space<vmem>>, %arg9: memref<16x64xf32, #tpu.memory_space<vmem>>) attributes {dimension_semantics = [], scalar_prefetch = 0 : i64, scratch_operands = 0 : i64, tpu.core_type = #tpu.core_type<tc>} {
    %c0 = arith.constant 0 : index
    %c0_0 = arith.constant 0 : index
    %0 = vector.load %arg0[%c0, %c0_0] : memref<16x16xf32, #tpu.memory_space<vmem>>, vector<16x16xf32>
    %c0_1 = arith.constant 0 : index
    %c0_2 = arith.constant 0 : index
    %1 = vector.load %arg1[%c0_1, %c0_2] : memref<16x16xf32, #tpu.memory_space<vmem>>, vector<16x16xf32>
    %c0_3 = arith.constant 0 : index
    %c0_4 = arith.constant 0 : index
    %c0_5 = arith.constant 0 : index
    %c0_6 = arith.constant 0 : index
    %2 = vector.load %arg2[%c0_3, %c0_4, %c0_5, %c0_6] : memref<3x3x16x64xf32, #tpu.memory_space<vmem>>, vector<3x3x16x64xf32>
    %c0_7 = arith.constant 0 : index
    %c0_8 = arith.constant 0 : index
    %c0_9 = arith.constant 0 : index
    %3 = vector.load %arg3[%c0_7, %c0_8, %c0_9] : memref<3x1x64xf32, #tpu.memory_space<vmem>>, vector<3x1x64xf32>
    %c0_10 = arith.constant 0 : index
    %c0_11 = arith.constant 0 : index
    %4 = vector.load %arg4[%c0_10, %c0_11] : memref<64x16xf32, #tpu.memory_space<vmem>>, vector<64x16xf32>
    %c0_12 = arith.constant 0 : index
    %c0_13 = arith.constant 0 : index
    %5 = vector.load %arg5[%c0_12, %c0_13] : memref<1x16xf32, #tpu.memory_space<vmem>>, vector<1x16xf32>
    %c0_14 = arith.constant 0 : index
    %c0_15 = arith.constant 0 : index
    %6 = vector.load %arg6[%c0_14, %c0_15] : memref<16x64xf32, #tpu.memory_space<vmem>>, vector<16x64xf32>
    %c0_16 = arith.constant 0 : index
    %c0_17 = arith.constant 0 : index
    %7 = vector.load %arg7[%c0_16, %c0_17] : memref<1x64xf32, #tpu.memory_space<vmem>>, vector<1x64xf32>
    %c0_18 = arith.constant 0 : index
    %c0_19 = arith.constant 0 : index
    %8 = vector.load %arg8[%c0_18, %c0_19] : memref<64x64xf32, #tpu.memory_space<vmem>>, vector<64x64xf32>
    %9 = vector.extract_strided_slice %2 {offsets = [0, 0, 0, 0], sizes = [1, 1, 16, 64], strides = [1, 1, 1, 1]} : vector<3x3x16x64xf32> to vector<1x1x16x64xf32>
    %10 = vector.shape_cast %9 : vector<1x1x16x64xf32> to vector<16x64xf32>
    %cst = arith.constant dense<0.000000e+00> : vector<16x64xf32>
    %11 = tpu.matmul %0, %10, %cst {dimension_numbers = #tpu.dot_dimension_numbers<[1], [0], [0], [1], [0, 0, 1, 1], [], []>} : vector<16x16xf32>, vector<16x64xf32>, vector<16x64xf32> -> vector<16x64xf32>
    %12 = vector.extract_strided_slice %3 {offsets = [0, 0, 0], sizes = [1, 1, 64], strides = [1, 1, 1]} : vector<3x1x64xf32> to vector<1x1x64xf32>
    %13 = vector.shape_cast %12 : vector<1x1x64xf32> to vector<1x64xf32>
    %14 = vector.broadcast %13 : vector<1x64xf32> to vector<16x64xf32>
    %15 = arith.addf %11, %14 : vector<16x64xf32>
    %cst_20 = arith.constant 0.000000e+00 : f32
    %16 = vector.broadcast %cst_20 : f32 to vector<16x64xf32>
    %17 = arith.maximumf %15, %16 : vector<16x64xf32>
    %cst_21 = arith.constant dense<0.000000e+00> : vector<16x16xf32>
    %18 = tpu.matmul %17, %4, %cst_21 {dimension_numbers = #tpu.dot_dimension_numbers<[1], [0], [0], [1], [0, 0, 1, 1], [], []>} : vector<16x64xf32>, vector<64x16xf32>, vector<16x16xf32> -> vector<16x16xf32>
    %19 = vector.broadcast %5 : vector<1x16xf32> to vector<16x16xf32>
    %20 = arith.addf %18, %19 : vector<16x16xf32>
    %cst_22 = arith.constant dense<0.000000e+00> : vector<16x64xf32>
    %21 = tpu.matmul %20, %6, %cst_22 {dimension_numbers = #tpu.dot_dimension_numbers<[1], [0], [0], [1], [0, 0, 1, 1], [], []>} : vector<16x16xf32>, vector<16x64xf32>, vector<16x64xf32> -> vector<16x64xf32>
    %22 = vector.broadcast %7 : vector<1x64xf32> to vector<16x64xf32>
    %23 = arith.addf %21, %22 : vector<16x64xf32>
    %24 = arith.negf %23 : vector<16x64xf32>
    %25 = math.exp %24 : vector<16x64xf32>
    %cst_23 = arith.constant 1.000000e+00 : f32
    %26 = vector.broadcast %cst_23 : f32 to vector<16x64xf32>
    %27 = arith.addf %26, %25 : vector<16x64xf32>
    %28 = arith.divf %26, %27 : vector<16x64xf32>
    %29 = vector.extract_strided_slice %2 {offsets = [1, 0, 0, 0], sizes = [1, 1, 16, 64], strides = [1, 1, 1, 1]} : vector<3x3x16x64xf32> to vector<1x1x16x64xf32>
    %30 = vector.shape_cast %29 : vector<1x1x16x64xf32> to vector<16x64xf32>
    %cst_24 = arith.constant dense<0.000000e+00> : vector<16x64xf32>
    %31 = tpu.matmul %20, %30, %cst_24 {dimension_numbers = #tpu.dot_dimension_numbers<[1], [0], [0], [1], [0, 0, 1, 1], [], []>} : vector<16x16xf32>, vector<16x64xf32>, vector<16x64xf32> -> vector<16x64xf32>
    %cst_25 = arith.constant dense<0.000000e+00> : vector<16x16xf32>
    %32 = tpu.matmul %1, %20, %cst_25 {dimension_numbers = #tpu.dot_dimension_numbers<[1], [0], [0], [1], [0, 0, 1, 1], [], []>} : vector<16x16xf32>, vector<16x16xf32>, vector<16x16xf32> -> vector<16x16xf32>
    %33 = vector.extract_strided_slice %2 {offsets = [1, 1, 0, 0], sizes = [1, 1, 16, 64], strides = [1, 1, 1, 1]} : vector<3x3x16x64xf32> to vector<1x1x16x64xf32>
    %34 = vector.shape_cast %33 : vector<1x1x16x64xf32> to vector<16x64xf32>
    %cst_26 = arith.constant dense<0.000000e+00> : vector<16x64xf32>
    %35 = tpu.matmul %32, %34, %cst_26 {dimension_numbers = #tpu.dot_dimension_numbers<[1], [0], [0], [1], [0, 0, 1, 1], [], []>} : vector<16x16xf32>, vector<16x64xf32>, vector<16x64xf32> -> vector<16x64xf32>
    %36 = arith.addf %31, %35 : vector<16x64xf32>
    %37 = vector.extract_strided_slice %3 {offsets = [1, 0, 0], sizes = [1, 1, 64], strides = [1, 1, 1]} : vector<3x1x64xf32> to vector<1x1x64xf32>
    %38 = vector.shape_cast %37 : vector<1x1x64xf32> to vector<1x64xf32>
    %39 = vector.broadcast %38 : vector<1x64xf32> to vector<16x64xf32>
    %40 = arith.addf %36, %39 : vector<16x64xf32>
    %cst_27 = arith.constant 0.000000e+00 : f32
    %41 = vector.broadcast %cst_27 : f32 to vector<16x64xf32>
    %42 = arith.maximumf %40, %41 : vector<16x64xf32>
    %cst_28 = arith.constant dense<0.000000e+00> : vector<16x16xf32>
    %43 = tpu.matmul %42, %4, %cst_28 {dimension_numbers = #tpu.dot_dimension_numbers<[1], [0], [0], [1], [0, 0, 1, 1], [], []>} : vector<16x64xf32>, vector<64x16xf32>, vector<16x16xf32> -> vector<16x16xf32>
    %44 = vector.broadcast %5 : vector<1x16xf32> to vector<16x16xf32>
    %45 = arith.addf %43, %44 : vector<16x16xf32>
    %cst_29 = arith.constant dense<0.000000e+00> : vector<16x64xf32>
    %46 = tpu.matmul %45, %6, %cst_29 {dimension_numbers = #tpu.dot_dimension_numbers<[1], [0], [0], [1], [0, 0, 1, 1], [], []>} : vector<16x16xf32>, vector<16x64xf32>, vector<16x64xf32> -> vector<16x64xf32>
    %47 = vector.broadcast %7 : vector<1x64xf32> to vector<16x64xf32>
    %48 = arith.addf %46, %47 : vector<16x64xf32>
    %49 = arith.negf %48 : vector<16x64xf32>
    %50 = math.exp %49 : vector<16x64xf32>
    %cst_30 = arith.constant 1.000000e+00 : f32
    %51 = vector.broadcast %cst_30 : f32 to vector<16x64xf32>
    %52 = arith.addf %51, %50 : vector<16x64xf32>
    %53 = arith.divf %51, %52 : vector<16x64xf32>
    %54 = vector.extract_strided_slice %2 {offsets = [2, 0, 0, 0], sizes = [1, 1, 16, 64], strides = [1, 1, 1, 1]} : vector<3x3x16x64xf32> to vector<1x1x16x64xf32>
    %55 = vector.shape_cast %54 : vector<1x1x16x64xf32> to vector<16x64xf32>
    %cst_31 = arith.constant dense<0.000000e+00> : vector<16x64xf32>
    %56 = tpu.matmul %45, %55, %cst_31 {dimension_numbers = #tpu.dot_dimension_numbers<[1], [0], [0], [1], [0, 0, 1, 1], [], []>} : vector<16x16xf32>, vector<16x64xf32>, vector<16x64xf32> -> vector<16x64xf32>
    %cst_32 = arith.constant dense<0.000000e+00> : vector<16x16xf32>
    %57 = tpu.matmul %1, %45, %cst_32 {dimension_numbers = #tpu.dot_dimension_numbers<[1], [0], [0], [1], [0, 0, 1, 1], [], []>} : vector<16x16xf32>, vector<16x16xf32>, vector<16x16xf32> -> vector<16x16xf32>
    %58 = vector.extract_strided_slice %2 {offsets = [2, 1, 0, 0], sizes = [1, 1, 16, 64], strides = [1, 1, 1, 1]} : vector<3x3x16x64xf32> to vector<1x1x16x64xf32>
    %59 = vector.shape_cast %58 : vector<1x1x16x64xf32> to vector<16x64xf32>
    %cst_33 = arith.constant dense<0.000000e+00> : vector<16x64xf32>
    %60 = tpu.matmul %57, %59, %cst_33 {dimension_numbers = #tpu.dot_dimension_numbers<[1], [0], [0], [1], [0, 0, 1, 1], [], []>} : vector<16x16xf32>, vector<16x64xf32>, vector<16x64xf32> -> vector<16x64xf32>
    %61 = arith.addf %56, %60 : vector<16x64xf32>
    %cst_34 = arith.constant dense<0.000000e+00> : vector<16x16xf32>
    %62 = tpu.matmul %1, %57, %cst_34 {dimension_numbers = #tpu.dot_dimension_numbers<[1], [0], [0], [1], [0, 0, 1, 1], [], []>} : vector<16x16xf32>, vector<16x16xf32>, vector<16x16xf32> -> vector<16x16xf32>
    %63 = vector.extract_strided_slice %2 {offsets = [2, 2, 0, 0], sizes = [1, 1, 16, 64], strides = [1, 1, 1, 1]} : vector<3x3x16x64xf32> to vector<1x1x16x64xf32>
    %64 = vector.shape_cast %63 : vector<1x1x16x64xf32> to vector<16x64xf32>
    %cst_35 = arith.constant dense<0.000000e+00> : vector<16x64xf32>
    %65 = tpu.matmul %62, %64, %cst_35 {dimension_numbers = #tpu.dot_dimension_numbers<[1], [0], [0], [1], [0, 0, 1, 1], [], []>} : vector<16x16xf32>, vector<16x64xf32>, vector<16x64xf32> -> vector<16x64xf32>
    %66 = arith.addf %61, %65 : vector<16x64xf32>
    %67 = vector.extract_strided_slice %3 {offsets = [2, 0, 0], sizes = [1, 1, 64], strides = [1, 1, 1]} : vector<3x1x64xf32> to vector<1x1x64xf32>
    %68 = vector.shape_cast %67 : vector<1x1x64xf32> to vector<1x64xf32>
    %69 = vector.broadcast %68 : vector<1x64xf32> to vector<16x64xf32>
    %70 = arith.addf %66, %69 : vector<16x64xf32>
    %cst_36 = arith.constant 0.000000e+00 : f32
    %71 = vector.broadcast %cst_36 : f32 to vector<16x64xf32>
    %72 = arith.maximumf %70, %71 : vector<16x64xf32>
    %cst_37 = arith.constant dense<0.000000e+00> : vector<16x16xf32>
    %73 = tpu.matmul %72, %4, %cst_37 {dimension_numbers = #tpu.dot_dimension_numbers<[1], [0], [0], [1], [0, 0, 1, 1], [], []>} : vector<16x64xf32>, vector<64x16xf32>, vector<16x16xf32> -> vector<16x16xf32>
    %74 = vector.broadcast %5 : vector<1x16xf32> to vector<16x16xf32>
    %75 = arith.addf %73, %74 : vector<16x16xf32>
    %cst_38 = arith.constant dense<0.000000e+00> : vector<16x64xf32>
    %76 = tpu.matmul %75, %6, %cst_38 {dimension_numbers = #tpu.dot_dimension_numbers<[1], [0], [0], [1], [0, 0, 1, 1], [], []>} : vector<16x16xf32>, vector<16x64xf32>, vector<16x64xf32> -> vector<16x64xf32>
    %77 = vector.broadcast %7 : vector<1x64xf32> to vector<16x64xf32>
    %78 = arith.addf %76, %77 : vector<16x64xf32>
    %79 = arith.negf %78 : vector<16x64xf32>
    %80 = math.exp %79 : vector<16x64xf32>
    %cst_39 = arith.constant 1.000000e+00 : f32
    %81 = vector.broadcast %cst_39 : f32 to vector<16x64xf32>
    %82 = arith.addf %81, %80 : vector<16x64xf32>
    %83 = arith.divf %81, %82 : vector<16x64xf32>
    %cst_40 = arith.constant dense<0.000000e+00> : vector<16x64xf32>
    %84 = tpu.matmul %28, %8, %cst_40 {dimension_numbers = #tpu.dot_dimension_numbers<[1], [0], [0], [1], [0, 0, 1, 1], [], []>} : vector<16x64xf32>, vector<64x64xf32>, vector<16x64xf32> -> vector<16x64xf32>
    %cst_41 = arith.constant dense<0.000000e+00> : vector<16x64xf32>
    %85 = tpu.matmul %53, %8, %cst_41 {dimension_numbers = #tpu.dot_dimension_numbers<[1], [0], [0], [1], [0, 0, 1, 1], [], []>} : vector<16x64xf32>, vector<64x64xf32>, vector<16x64xf32> -> vector<16x64xf32>
    %cst_42 = arith.constant dense<0.000000e+00> : vector<16x64xf32>
    %86 = tpu.matmul %83, %8, %cst_42 {dimension_numbers = #tpu.dot_dimension_numbers<[1], [0], [0], [1], [0, 0, 1, 1], [], []>} : vector<16x64xf32>, vector<64x64xf32>, vector<16x64xf32> -> vector<16x64xf32>
    %87 = arith.maximumf %84, %85 : vector<16x64xf32>
    %88 = arith.maximumf %87, %86 : vector<16x64xf32>
    %89 = arith.subf %84, %88 : vector<16x64xf32>
    %90 = math.exp %89 : vector<16x64xf32>
    %91 = arith.subf %85, %88 : vector<16x64xf32>
    %92 = math.exp %91 : vector<16x64xf32>
    %93 = arith.subf %86, %88 : vector<16x64xf32>
    %94 = math.exp %93 : vector<16x64xf32>
    %95 = arith.addf %90, %92 : vector<16x64xf32>
    %96 = arith.addf %95, %94 : vector<16x64xf32>
    %97 = tpu.reciprocal %96 {approx = true} : vector<16x64xf32> -> vector<16x64xf32>
    %98 = arith.mulf %28, %90 : vector<16x64xf32>
    %99 = arith.mulf %53, %92 : vector<16x64xf32>
    %100 = arith.addf %98, %99 : vector<16x64xf32>
    %101 = arith.mulf %83, %94 : vector<16x64xf32>
    %102 = arith.addf %100, %101 : vector<16x64xf32>
    %103 = arith.mulf %102, %97 : vector<16x64xf32>
    %c0_43 = arith.constant 0 : index
    %c0_44 = arith.constant 0 : index
    %104 = vector.load %arg9[%c0_43, %c0_44] : memref<16x64xf32, #tpu.memory_space<vmem>>, vector<16x64xf32>
    tpu.vector_store %arg9[%c0_43, %c0_44], %103 {strides = array<i32>} : memref<16x64xf32, #tpu.memory_space<vmem>>, vector<16x64xf32>,
    return
  }
}

</mosaic_0001>

<bundles_post_ra>
// kernel: mra_gcn_forward.1
= control target key start
LH: loop header
LB: loop body
LE: loop exit
PB: predicated region body
PF: predicated region fallthrough
CT: control target
= control target key end

     0   :  { %vm77_vm0 = vcmask 130048   ;;  %vm167_vm1 = vcmask 523264   ;;  %s2472_s2 = inlined_call_operand.vmem [shape: f32[3,3,16,64], index: 2, kind: input, shape index: {}]   ;;  %s2473_s0 = inlined_call_operand.vmem [shape: f32[16,16], index: 0, kind: input, shape index: {}]   ;;  %s2474_s4 = inlined_call_operand.vmem [shape: f32[64,16], index: 4, kind: input, shape index: {}]   ;;  %s2475_s3 = inlined_call_operand.vmem [shape: f32[3,1,64], index: 3, kind: input, shape index: {}]   ;;  %s2476_s6 = inlined_call_operand.vmem [shape: f32[16,64], index: 6, kind: input, shape index: {}]   ;;  %s2477_s5 = inlined_call_operand.vmem [shape: f32[1,16], index: 5, kind: input, shape index: {}]   ;;  %s2478_s1 = inlined_call_operand.vmem [shape: f32[16,16], index: 1, kind: input, shape index: {}]   ;;  %s2479_s8 = inlined_call_operand.vmem [shape: f32[64,64], index: 8, kind: input, shape index: {}]   ;;  %s2480_s7 = inlined_call_operand.vmem [shape: f32[1,64], index: 7, kind: input, shape index: {}]   ;;  %s2481_s9 = inlined_call_operand.vmem [shape: f32[16,64], index: 9, kind: output, shape index: {}]  }
   0x1   :  { %v36_v0 = vld [vmem:[%s2472_s2] sm:$0xff]  ;;  %v37_v1 = vld [vmem:[%s2472_s2 + $0x8] sm:$0xff]  ;;  %v53_v7 = vld [vmem:[%s2474_s4 + $0x10] sm:$0xff] }
   0x2   :  { %v32_v2 = vld [vmem:[%s2473_s0] sm:$0xff]  ;;  %v1984_v3 = vpack.c.bf16 %v37_v1, %v36_v0  ;;  %v52_v5 = vld [vmem:[%s2474_s4 + $0x8] sm:$0xff]  ;;  %v54_v8 = vld [vmem:[%s2474_s4 + $0x18] sm:$0xff] }
   0x3   :  { %1790 = vmatprep.mubr.msk.f32.mxu1 %vm77_vm0, %v32_v2  ;;  %v51_v4 = vld [vmem:[%s2474_s4] sm:$0xff]  ;;  %v33_v9 = vld [vmem:[%s2473_s0 + $0x8] sm:$0xff]  ;;  %v2252_v10 = vpack.c.bf16 %v54_v8, %v53_v7  ;;  %v57_v14 = vld [vmem:[%s2474_s4 + $0x30] sm:$0xff] }
   0x4   :  { %v2240_v6 = vpack.c.bf16 %v52_v5, %v51_v4  ;;  %1985 = vmatprep.subr.bf16.mxu1 %v1984_v3  ;;  %v55_v11 = vld [vmem:[%s2474_s4 + $0x20] sm:$0xff]  ;;  %v56_v12 = vld [vmem:[%s2474_s4 + $0x28] sm:$0xff]  ;;  %v58_v15 = vld [vmem:[%s2474_s4 + $0x38] sm:$0xff] }
   0x5   :  { %1987 = vmatpush3.bf16.msra.mxu1 %v1984_v3  ;;  %v2263_v13 = vpack.c.bf16 %v56_v12, %v55_v11  ;;  %v2274_v16 = vpack.c.bf16 %v58_v15, %v57_v14  ;;  %v1631_v17 = vld [vmem:[%s2475_s3] ss:$0 sm:$0xff]  ;;  %v61_v25 = vld [vmem:[%s2476_s6 + $0x8] sm:$0xff]  ;;  %v38_v38 = vld [vmem:[%s2472_s2 + $0x30] sm:$0xff] }
   0x6   :  { %1989 = vmatprep.subr.bf16.mxu1 %v2240_v6  ;;  %v60_v24 = vld [vmem:[%s2476_s6] sm:$0xff]  ;;  %v2317_v34 = vld [vmem:[%s2478_s1 + $0x8] sm:$0xff]  ;;  %v39_v39 = vld [vmem:[%s2472_s2 + $0x38] sm:$0xff] }
   0x7   :  { %v2297_v26 = vpack.c.bf16 %v61_v25, %v60_v24  ;;  %v2304_v27 = vld [vmem:[%s2477_s5] ss:$0 sm:$0xff]  ;;  %v41_v36 = vld [vmem:[%s2472_s2 + $0x48] sm:$0xff]  ;;  %v2016_v40 = vpack.c.bf16 %v39_v39, %v38_v38  ;;  %v1648_v45 = vld [vmem:[%s2475_s3 + $0x1] ss:$0 sm:$0xff] }
   0x8   :  { %1791 = vmatmul.mubr.msk.f32.vlgmr.msra.gmra.mrb[0].mxu1 %vm77_vm0, %v33_v9  ;;  %v34_v32 = vld [vmem:[%s2478_s1] sm:$0xff]  ;;  %v44_v57 = vld [vmem:[%s2472_s2 + $0x70] sm:$0xff]  ;;  %v45_v58 = vld [vmem:[%s2472_s2 + $0x78] sm:$0xff] }
   0x9   :  { %1991 = vmatpush3.bf16.msra.mxu1 %v2240_v6  ;;  %2005 = vmatprep.subr.bf16.mxu0 %v2297_v26  ;;  %v40_v35 = vld [vmem:[%s2472_s2 + $0x40] sm:$0xff]  ;;  %v2044_v59 = vpack.c.bf16 %v45_v58, %v44_v57  ;;  %v43_v61 = vld [vmem:[%s2472_s2 + $0x68] sm:$0xff]  ;;  %v65_v24 = vld [vmem:[%s2479_s8 + $0x10] sm:$0xff] }
   0xa   :  { %1993 = vmatprep.subr.bf16.mxu1 %v2252_v10  ;;  %2007 = vmatpush3.bf16.msra.mxu0 %v2297_v26  ;;  %v2012_v37 = vpack.c.bf16 %v41_v36, %v40_v35  ;;  %v42_v60 = vld [vmem:[%s2472_s2 + $0x60] sm:$0xff]  ;;  %v47_v2 = vld [vmem:[%s2472_s2 + $0x88] sm:$0xff]  ;;  %v66_v25 = vld [vmem:[%s2479_s8 + $0x18] sm:$0xff] }
   0xb   :  { %v2048_v62 = vpack.c.bf16 %v43_v61, %v42_v60  ;;  %v46_v1 = vld [vmem:[%s2472_s2 + $0x80] sm:$0xff]  ;;  %v69_v36 = vld [vmem:[%s2479_s8 + $0x30] sm:$0xff] }
   0xc   :  { %v2056_v7 = vpack.c.bf16 %v47_v2, %v46_v1  ;;  %v2405_v12 = vld [vmem:[%s2480_s7] ss:$0 sm:$0xff] }
   0xd   :  { %1995 = vmatpush3.bf16.msra.mxu1 %v2252_v10 }
   0xe   :  { %1997 = vmatprep.subr.bf16.mxu1 %v2263_v13 }
  0x11   :  { %1999 = vmatpush3.bf16.msra.mxu1 %v2263_v13 }
  0x12   :  { %2001 = vmatprep.subr.bf16.mxu1 %v2274_v16 }
  0x15   :  { %2003 = vmatpush3.bf16.msra.mxu1 %v2274_v16 }
  0x16   :  { %2021 = vmatprep.subr.bf16.mxu1 %v2240_v6 }
  0xdb   :  { %v1792_v18 = vpop.f32.mrb[0].mxu1 }
  0xdc   :  { %v156_v19 = vadd.f32 %v1792_v18, %v1631_v17  ;;  %v150_v20 = vpop.f32.mrb[1].mxu1 }
  0xdd   :  { %v151_v21 = vadd.f32 %v1631_v17, %v150_v20 }
  0xde   :  { %v160_v23 = vmax.f32 %v156_v19, 0.0  ;;  %v1665_v19 = vld [vmem:[%s2475_s3 + $0x2] ss:$0 sm:$0xff] }
  0xdf   :  { %v159_v22 = vmax.f32 %v151_v21, 0.0 }
  0xe1   :  { %1809 = vmatprep.mubr.msk.f32.mxu1 %vm167_vm1, %v159_v22 }
  0xe2   :  { %1810 = vmatmul.mubr.msk.f32.vlgmr.msra.gmra.mrb[2].mxu1 %vm167_vm1, %v160_v23 }
  0xe3   :  { %2023 = vmatpush3.bf16.msra.mxu1 %v2240_v6 }
  0xe4   :  { %2025 = vmatprep.subr.bf16.mxu1 %v2252_v10 }
  0xe7   :  { %2027 = vmatpush3.bf16.msra.mxu1 %v2252_v10 }
  0xe8   :  { %2029 = vmatprep.subr.bf16.mxu1 %v2263_v13 }
  0xeb   :  { %2031 = vmatpush3.bf16.msra.mxu1 %v2263_v13 }
  0xec   :  { %2033 = vmatprep.subr.bf16.mxu1 %v2274_v16 }
  0xef   :  { %2035 = vmatpush3.bf16.msra.mxu1 %v2274_v16 }
 0x1b5   :  { %v1811_v28 = vpop.f32.mrb[2].mxu1 }
 0x1b6   :  { %v246_v29 = vadd.f32 %v1811_v28, %v2304_v27  ;;  %v240_v30 = vpop.f32.mrb[3].mxu1 }
 0x1b7   :  { %v241_v31 = vadd.f32 %v2304_v27, %v240_v30  ;;  %v2084_v30 = vpack.c.bf16 %v66_v25, %v65_v24 }
 0x1b9   :  { %1816 = vmatprep.mubr.msk.f32.mxu0 %vm77_vm0, %v241_v31  ;;  %v2008_v33 = vpack.c.bf16 %v246_v29, %v241_v31 }
 0x1ba   :  { %1817 = vmatmul.mubr.msk.f32.vlgmr.msra.gmra.mrb[0].mxu0 %vm77_vm0, %v246_v29 }
 0x1bb   :  { %2009 = vmatprep.subr.bf16.mxu0 %v2008_v33  ;;  %1823 = vmatprep.mubr.msk.f32.mxu0 %vm77_vm0, %v34_v32 }
 0x1bc   :  { %2011 = vmatpush3.bf16.msra.mxu0 %v2008_v33 }
 0x1bd   :  { %2013 = vmatprep.subr.bf16.mxu0 %v2012_v37 }
 0x1bf   :  { %1824 = vmatmul.mubr.msk.f32.vlgmr.msra.gmra.mrb[2].mxu0 %vm77_vm0, %v2317_v34 }
 0x1c0   :  { %2015 = vmatpush3.bf16.msra.mxu0 %v2012_v37  ;;  %v70_v37 = vld [vmem:[%s2479_s8 + $0x38] sm:$0xff] }
 0x1c1   :  { %2017 = vmatprep.subr.bf16.mxu0 %v2016_v40  ;;  %v2092_v38 = vpack.c.bf16 %v70_v37, %v69_v36 }
 0x28d   :  { %v2333_v41 = vpop.f32.mrb[0].mxu0 }
 0x28e   :  { %v2335_v42 = vpop.f32.mrb[1].mxu0 }
 0x292   :  { %v1825_v43 = vpop.f32.mrb[2].mxu0 }
 0x293   :  { %v420_v44 = vpop.f32.mrb[3].mxu0 }
 0x294   :  { %1830 = vmatprep.mubr.msk.f32.mxu0 %vm77_vm0, %v420_v44  ;;  %v333_v44 = vadd.f32 %v2333_v41, %v2405_v12 }
 0x295   :  { %1831 = vmatmul.mubr.msk.f32.vlgmr.msra.gmra.mrb[4].mxu0 %vm77_vm0, %v1825_v43 }
 0x296   :  { %2019 = vmatpush3.bf16.msra.mxu0 %v2016_v40  ;;  %1837 = vmatprep.mubr.msk.f32.mxu0 %vm77_vm0, %v241_v31  ;;  %v67_v31 = vld [vmem:[%s2479_s8 + $0x20] sm:$0xff]  ;;  %v328_v40 = vadd.f32 %v2405_v12, %v2335_v42 }
 0x297   :  { %2037 = vmatprep.subr.bf16.mxu0 %v2297_v26 }
 0x298   :  { %v1640_v43 = vmul.f32 -1.442695, %v328_v40 }
 0x29d   :  { %1838 = vmatmul.mubr.msk.f32.vlgmr.msra.gmra.mrb[4].mxu0 %vm77_vm0, %v246_v29 }
 0x29e   :  { %2039 = vmatpush3.bf16.msra.mxu0 %v2297_v26 }
 0x370   :  { %v1839_v46 = vpop.f32.mrb[4].mxu0 }
 0x371   :  { %v592_v47 = vadd.f32 %v1839_v46, %v1648_v45  ;;  %v576_v48 = vpop.f32.mrb[5].mxu0  ;;  %v1641_v46 = vmul.f32 -1.442695, %v333_v44 }
 0x372   :  { %v591_v49 = vadd.f32 %v1648_v45, %v576_v48 }
 0x373   :  { %v594_v51 = vmax.f32 %v592_v47, 0.0 }
 0x374   :  { %v593_v50 = vmax.f32 %v591_v49, 0.0 }
 0x376   :  { %1856 = vmatprep.mubr.msk.f32.mxu1 %vm167_vm1, %v593_v50 }
 0x377   :  { %1857 = vmatmul.mubr.msk.f32.vlgmr.msra.gmra.mrb[4].mxu1 %vm167_vm1, %v594_v51 }
 0x378   :  { %1891 = vmatprep.mubr.msk.f32.mxu1 %vm77_vm0, %v34_v32 }
 0x44a   :  { %v1858_v52 = vpop.f32.mrb[4].mxu1 }
 0x44b   :  { %v673_v53 = vadd.f32 %v1858_v52, %v2304_v27  ;;  %v667_v54 = vpop.f32.mrb[5].mxu1 }
 0x44c   :  { %v668_v55 = vadd.f32 %v2304_v27, %v667_v54 }
 0x44e   :  { %1863 = vmatprep.mubr.msk.f32.mxu0 %vm77_vm0, %v668_v55  ;;  %v2040_v56 = vpack.c.bf16 %v673_v53, %v668_v55 }
 0x44f   :  { %1864 = vmatmul.mubr.msk.f32.vlgmr.msra.gmra.mrb[6].mxu0 %vm77_vm0, %v673_v53 }
 0x450   :  { %2041 = vmatprep.subr.bf16.mxu0 %v2040_v56  ;;  %1870 = vmatprep.mubr.msk.f32.mxu0 %vm77_vm0, %v34_v32  ;;  %v68_v32 = vld [vmem:[%s2479_s8 + $0x28] sm:$0xff] }
 0x451   :  { %2043 = vmatpush3.bf16.msra.mxu0 %v2040_v56  ;;  %v2088_v35 = vpack.c.bf16 %v68_v32, %v67_v31 }
 0x452   :  { %2045 = vmatprep.subr.bf16.mxu0 %v2044_v59 }
 0x454   :  { %1871 = vmatmul.mubr.msk.f32.vlgmr.msra.gmra.mrb[8].mxu0 %vm77_vm0, %v2317_v34 }
 0x455   :  { %2047 = vmatpush3.bf16.msra.mxu0 %v2044_v59 }
 0x456   :  { %2049 = vmatprep.subr.bf16.mxu0 %v2048_v62 }
 0x522   :  { %v1865_v63 = vpop.f32.mrb[6].mxu0 }
 0x523   :  { %v748_v0 = vpop.f32.mrb[7].mxu0  ;;  %v754_v15 = vadd.f32 %v1865_v63, %v2405_v12 }
 0x525   :  { %v1654_v17 = vmul.f32 -1.442695, %v754_v15 }
 0x527   :  { %v1872_v3 = vpop.f32.mrb[8].mxu0 }
 0x528   :  { %v835_v4 = vpop.f32.mrb[9].mxu0 }
 0x529   :  { %v2052_v5 = vpack.c.bf16 %v1872_v3, %v835_v4  ;;  %1877 = vmatprep.mubr.msk.f32.mxu0 %vm77_vm0, %v835_v4 }
 0x52a   :  { %1878 = vmatmul.mubr.msk.f32.vlgmr.msra.gmra.mrb[10].mxu0 %vm77_vm0, %v1872_v3 }
 0x52b   :  { %1884 = vmatprep.mubr.msk.f32.mxu0 %vm77_vm0, %v668_v55  ;;  %2053 = vmatprep.subr.bf16.mxu1 %v2052_v5 }
 0x52c   :  { %2055 = vmatpush3.bf16.msra.mxu1 %v2052_v5  ;;  %2051 = vmatpush3.bf16.msra.mxu0 %v2048_v62 }
 0x52d   :  { %2057 = vmatprep.subr.bf16.mxu0 %v2056_v7  ;;  %2061 = vmatprep.subr.bf16.mxu1 %v2240_v6 }
 0x52f   :  { %1892 = vmatmul.mubr.msk.f32.vlgmr.msra.gmra.mrb[6].mxu1 %vm77_vm0, %v2317_v34 }
 0x530   :  { %2063 = vmatpush3.bf16.msra.mxu1 %v2240_v6  ;;  %v63_v6 = vld [vmem:[%s2479_s8] sm:$0xff] }
 0x531   :  { %2065 = vmatprep.subr.bf16.mxu1 %v2252_v10 }
 0x532   :  { %1885 = vmatmul.mubr.msk.f32.vlgmr.msra.gmra.mrb[10].mxu0 %vm77_vm0, %v673_v53 }
 0x533   :  { %2059 = vmatpush3.bf16.msra.mxu0 %v2056_v7 }
 0x534   :  { %2067 = vmatpush3.bf16.msra.mxu1 %v2252_v10  ;;  %2077 = vmatprep.subr.bf16.mxu0 %v2297_v26  ;;  %v64_v10 = vld [vmem:[%s2479_s8 + $0x8] sm:$0xff] }
 0x535   :  { %2069 = vmatprep.subr.bf16.mxu1 %v2263_v13  ;;  %v2398_v11 = vpack.c.bf16 %v64_v10, %v63_v6 }
 0x538   :  { %2071 = vmatpush3.bf16.msra.mxu1 %v2263_v13  ;;  %v749_v13 = vadd.f32 %v2405_v12, %v748_v0 }
 0x539   :  { %2073 = vmatprep.subr.bf16.mxu1 %v2274_v16 }
 0x53a   :  { %v1653_v14 = vmul.f32 -1.442695, %v749_v13 }
 0x53c   :  { %2075 = vmatpush3.bf16.msra.mxu1 %v2274_v16  ;;  %2134 = vpow2.f32 %v1653_v14 }
 0x53d   :  { %2097 = vmatprep.subr.bf16.mxu1 %v2398_v11  ;;  %2136 = vpow2.f32 %v1654_v17 }
 0x546   :  { %v2135_v16 = vpop.eup %2134 }
 0x547   :  { %v763_v18 = vadd.f32 1.0, %v2135_v16  ;;  %v2137_v28 = vpop.eup %2136 }
 0x548   :  { %v764_v34 = vadd.f32 1.0, %v2137_v28 }
 0x549   :  { %2138 = vrcp.f32 %v763_v18 }
 0x54a   :  { %2140 = vrcp.f32 %v764_v34 }
 0x54b   :  { %2142 = vpow2.f32 %v1640_v43 }
 0x54c   :  { %2144 = vpow2.f32 %v1641_v46 }
 0x553   :  { %v2425_v33 = vpop.eup %2138 }
 0x554   :  { %v2437_v39 = vpop.eup %2140 }
 0x555   :  { %v2143_v45 = vpop.eup %2142 }
 0x556   :  { %v342_v47 = vadd.f32 1.0, %v2143_v45  ;;  %v2145_v51 = vpop.eup %2144 }
 0x557   :  { %v343_v53 = vadd.f32 1.0, %v2145_v51 }
 0x558   :  { %2146 = vrcp.f32 %v342_v47 }
 0x559   :  { %2148 = vrcp.f32 %v343_v53 }
 0x562   :  { %v2448_v42 = vpop.eup %2146 }
 0x563   :  { %v2149_v54 = vpop.eup %2148 }
 0x602   :  { %v1893_v8 = vpop.f32.mrb[6].mxu1 }
 0x603   :  { %v1066_v9 = vpop.f32.mrb[7].mxu1 }
 0x604   :  { %1898 = vmatprep.mubr.msk.f32.mxu0 %vm77_vm0, %v1066_v9 }
 0x605   :  { %1899 = vmatmul.mubr.msk.f32.vlgmr.msra.gmra.mrb[10].mxu0 %vm77_vm0, %v1893_v8 }
 0x606   :  { %2079 = vmatpush3.bf16.msra.mxu0 %v2297_v26 }
 0x607   :  { %2081 = vmatprep.subr.bf16.mxu0 %v2398_v11 }
 0x6d8   :  { %v1900_v20 = vpop.f32.mrb[10].mxu0 }
 0x6d9   :  { %v1165_v21 = vadd.f32 %v1900_v20, %v1665_v19  ;;  %v1147_v22 = vpop.f32.mrb[11].mxu0 }
 0x6da   :  { %v1164_v23 = vadd.f32 %v1665_v19, %v1147_v22 }
 0x6db   :  { %v1167_v29 = vmax.f32 %v1165_v21, 0.0 }
 0x6dc   :  { %v1166_v26 = vmax.f32 %v1164_v23, 0.0 }
 0x6de   :  { %1917 = vmatprep.mubr.msk.f32.mxu1 %vm167_vm1, %v1166_v26 }
 0x6df   :  { %1918 = vmatmul.mubr.msk.f32.vlgmr.msra.gmra.mrb[8].mxu1 %vm167_vm1, %v1167_v29 }
 0x6e0   :  { %2099 = vmatpush3.bf16.msra.mxu1 %v2398_v11  ;;  %1962 = vmatprep.mubr.msk.f32.mxu1 %vm167_vm1, %v2425_v33 }
 0x6e1   :  { %2101 = vmatprep.subr.bf16.mxu1 %v2084_v30 }
 0x6e4   :  { %2103 = vmatpush3.bf16.msra.mxu1 %v2084_v30 }
 0x6e5   :  { %2105 = vmatprep.subr.bf16.mxu1 %v2088_v35 }
 0x6e8   :  { %2107 = vmatpush3.bf16.msra.mxu1 %v2088_v35 }
 0x6e9   :  { %2109 = vmatprep.subr.bf16.mxu1 %v2092_v38 }
 0x6ec   :  { %2111 = vmatpush3.bf16.msra.mxu1 %v2092_v38 }
 0x6ef   :  { %1963 = vmatmul.mubr.msk.f32.vlgmr.msra.gmra.mrb[10].mxu1 %vm167_vm1, %v2437_v39 }
 0x7b2   :  { %v1919_v48 = vpop.f32.mrb[8].mxu1 }
 0x7b3   :  { %v1240_v49 = vpop.f32.mrb[9].mxu1  ;;  %v1246_v52 = vadd.f32 %v1919_v48, %v2304_v27 }
 0x7b4   :  { %v1241_v50 = vadd.f32 %v2304_v27, %v1240_v49 }
 0x7b6   :  { %1924 = vmatprep.mubr.msk.f32.mxu0 %vm77_vm0, %v1241_v50 }
 0x7b7   :  { %1925 = vmatmul.mubr.msk.f32.vlgmr.msra.gmra.mrb[12].mxu0 %vm77_vm0, %v1246_v52 }
 0x7b8   :  { %2083 = vmatpush3.bf16.msra.mxu0 %v2398_v11  ;;  %1943 = vmatprep.mubr.msk.f32.mxu0 %vm167_vm1, %v2448_v42 }
 0x7b9   :  { %2085 = vmatprep.subr.bf16.mxu0 %v2084_v30 }
 0x7bc   :  { %2087 = vmatpush3.bf16.msra.mxu0 %v2084_v30 }
 0x7bd   :  { %2089 = vmatprep.subr.bf16.mxu0 %v2088_v35 }
 0x7c0   :  { %2091 = vmatpush3.bf16.msra.mxu0 %v2088_v35 }
 0x7c1   :  { %2093 = vmatprep.subr.bf16.mxu0 %v2092_v38 }
 0x7c2   :  { %v1964_v41 = vpop.f32.mrb[10].mxu1 }
 0x7c3   :  { %v1495_v27 = vpop.f32.mrb[11].mxu1 }
 0x7c4   :  { %2095 = vmatpush3.bf16.msra.mxu0 %v2092_v38 }
 0x7c5   :  { %2113 = vmatprep.subr.bf16.mxu0 %v2398_v11 }
 0x7c7   :  { %1944 = vmatmul.mubr.msk.f32.vlgmr.msra.gmra.mrb[14].mxu0 %vm167_vm1, %v2149_v54 }
 0x7c8   :  { %2115 = vmatpush3.bf16.msra.mxu0 %v2398_v11 }
 0x7c9   :  { %2117 = vmatprep.subr.bf16.mxu0 %v2084_v30 }
 0x7cc   :  { %2119 = vmatpush3.bf16.msra.mxu0 %v2084_v30 }
 0x7cd   :  { %2121 = vmatprep.subr.bf16.mxu0 %v2088_v35 }
 0x7d0   :  { %2123 = vmatpush3.bf16.msra.mxu0 %v2088_v35 }
 0x7d1   :  { %2125 = vmatprep.subr.bf16.mxu0 %v2092_v38 }
 0x7d4   :  { %2127 = vmatpush3.bf16.msra.mxu0 %v2092_v38 }
 0x88a   :  { %v1926_v55 = vpop.f32.mrb[12].mxu0 }
 0x88b   :  { %v1327_v56 = vadd.f32 %v1926_v55, %v2405_v12  ;;  %v1321_v57 = vpop.f32.mrb[13].mxu0 }
 0x88c   :  { %v1322_v58 = vadd.f32 %v2405_v12, %v1321_v57 }
 0x88d   :  { %v1671_v59 = vmul.f32 -1.442695, %v1327_v56 }
 0x88e   :  { %v1670_v60 = vmul.f32 -1.442695, %v1322_v58 }
 0x88f   :  { %2150 = vpow2.f32 %v1671_v59 }
 0x890   :  { %2152 = vpow2.f32 %v1670_v60 }
 0x899   :  { %v2151_v61 = vpop.eup %2150 }
 0x89a   :  { %v2153_v62 = vpop.eup %2152  ;;  %v1337_v63 = vadd.f32 1.0, %v2151_v61  ;;  %v1945_v0 = vpop.f32.mrb[14].mxu0 }
 0x89b   :  { %v1336_v1 = vadd.f32 1.0, %v2153_v62  ;;  %v1586_v2 = vmax.f32 %v1945_v0, %v1964_v41  ;;  %v1414_v3 = vpop.f32.mrb[15].mxu0 }
 0x89c   :  { %v1585_v4 = vmax.f32 %v1414_v3, %v1495_v27 }
 0x89d   :  { %2154 = vrcp.f32 %v1336_v1 }
 0x89e   :  { %2156 = vrcp.f32 %v1337_v63 }
 0x8a7   :  { %v2155_v5 = vpop.eup %2154 }
 0x8a8   :  { %v2157_v7 = vpop.eup %2156  ;;  %1981 = vmatprep.mubr.msk.f32.mxu0 %vm167_vm1, %v2155_v5 }
 0x8a9   :  { %1982 = vmatmul.mubr.msk.f32.vlgmr.msra.gmra.mrb[16].mxu0 %vm167_vm1, %v2157_v7 }
 0x97c   :  { %v1983_v8 = vpop.f32.mrb[16].mxu0 }
 0x97d   :  { %v1588_v9 = vmax.f32 %v1586_v2, %v1983_v8  ;;  %v1576_v6 = vpop.f32.mrb[17].mxu0 }
 0x97e   :  { %v1587_v10 = vmax.f32 %v1585_v4, %v1576_v6 }
 0x97f   :  { %v1590_v11 = vsub.f32 %v1945_v0, %v1588_v9  ;;  %v1596_v12 = vsub.f32 %v1964_v41, %v1588_v9  ;;  %v1602_v13 = vsub.f32 %v1983_v8, %v1588_v9 }
 0x980   :  { %v1589_v14 = vsub.f32 %v1414_v3, %v1587_v10  ;;  %v1595_v15 = vsub.f32 %v1495_v27, %v1587_v10  ;;  %v1601_v16 = vsub.f32 %v1576_v6, %v1587_v10 }
 0x981   :  { %v1593_v17 = vmul.f32 1.442695, %v1590_v11  ;;  %v1599_v18 = vmul.f32 1.442695, %v1596_v12  ;;  %v1605_v19 = vmul.f32 1.442695, %v1602_v13 }
 0x982   :  { %v1591_v20 = vmul.f32 1.442695, %v1589_v14  ;;  %v1597_v21 = vmul.f32 1.442695, %v1595_v15  ;;  %v1603_v22 = vmul.f32 1.442695, %v1601_v16 }
 0x983   :  { %2158 = vpow2.f32 %v1593_v17 }
 0x984   :  { %2160 = vpow2.f32 %v1599_v18 }
 0x985   :  { %2162 = vpow2.f32 %v1605_v19 }
 0x986   :  { %2164 = vpow2.f32 %v1591_v20 }
 0x987   :  { %2166 = vpow2.f32 %v1597_v21 }
 0x988   :  { %2168 = vpow2.f32 %v1603_v22 }
 0x98d   :  { %v2159_v23 = vpop.eup %2158 }
 0x98e   :  { %v2161_v24 = vpop.eup %2160  ;;  %v1614_v25 = vmul.f32 %v2159_v23, %v2149_v54 }
 0x98f   :  { %v2163_v26 = vpop.eup %2162  ;;  %v1608_v28 = vadd.f32 %v2161_v24, %v2159_v23  ;;  %v1616_v29 = vmul.f32 %v2161_v24, %v2437_v39 }
 0x990   :  { %v2165_v30 = vpop.eup %2164  ;;  %v1620_v35 = vmul.f32 %v2163_v26, %v2157_v7 }
 0x991   :  { %v2167_v31 = vpop.eup %2166  ;;  %v1610_v32 = vadd.f32 %v2163_v26, %v1608_v28  ;;  %v1618_v34 = vadd.f32 %v1616_v29, %v1614_v25  ;;  %v1613_v36 = vmul.f32 %v2165_v30, %v2448_v42 }
 0x992   :  { %v2169_v37 = vpop.eup %2168  ;;  %v1607_v38 = vadd.f32 %v2167_v31, %v2165_v30  ;;  %v1615_v40 = vmul.f32 %v2167_v31, %v2425_v33 }
 0x993   :  { %2170 = vrcp.f32 %v1610_v32  ;;  %v1622_v43 = vadd.f32 %v1620_v35, %v1618_v34  ;;  %v1619_v46 = vmul.f32 %v2169_v37, %v2155_v5 }
 0x994   :  { %v1609_v44 = vadd.f32 %v2169_v37, %v1607_v38  ;;  %v1617_v45 = vadd.f32 %v1615_v40, %v1613_v36 }
 0x996   :  { %2172 = vrcp.f32 %v1609_v44  ;;  %v1621_v47 = vadd.f32 %v1619_v46, %v1617_v45 }
 0x99d   :  { %v2171_v48 = vpop.eup %2170 }
 0x99e   :  { %v1624_v39 = vmul.f32 %v2171_v48, %v1622_v43 }
 0x9a0   :  { %v2173_v49 = vpop.eup %2172  ;;  %1626 = vst.msk [vmem:[%s2481_s9 + $0x8] sm:$0xff] %vm167_vm1, %v1624_v39 }
 0x9a1   :  { %v1623_v50 = vmul.f32 %v2173_v49, %v1621_v47 }
 0x9a3   :  { %1625 = vst.msk [vmem:[%s2481_s9] sm:$0xff] %vm167_vm1, %v1623_v50 }

</bundles_post_ra>
